<compile_context>
chip_gen: v7x
topology: tpu7x:2x2x1
jax: 0.10.0
libtpu: 0.0.40
codegen_flags: <defaults>
</compile_context>

<pallas_src>
import jax
import jax.numpy as jnp
from jax.experimental import pallas as pl
from jax.experimental.pallas import tpu as pltpu

HIDDEN = 64            # nn.Linear(state_size, 64)
LANE = 128             # TPU lane width: hidden dim / matmul-N padded to this
SMALL_BATCH_MAX = 1024 # grid-less, fully VMEM-resident path up to here
BATCH_TILE_MAX = 4096  # max rows per grid step on the tiled path
ROW_TILE = 256         # row-tile granularity (multiple of 8/16, fills MXU rows)


def _round_up(n, m):
    return (n + m - 1) // m * m


def _cdiv(a, b):
    return (a + b - 1) // b


def dqn_kernel(x_ref, w1_ref, b1_ref, w2_ref, b2_ref, out_ref):
    # Fused MLP: two MXU matmuls (bf16 in, f32 accumulate) + f32 bias adds +
    # ReLU, all on VMEM-resident tiles.  x is cast to bf16 in-kernel (free on
    # idle VALU slots; avoids an extra HBM pass in the wrapper).
    x = x_ref[...].astype(jnp.bfloat16)                               # (TB, S)   bf16
    h = jnp.dot(x, w1_ref[...], preferred_element_type=jnp.float32)   # (TB, 128) f32
    h = jnp.maximum(h + b1_ref[...], 0.0)                             # bias + ReLU
    y = jnp.dot(h.astype(jnp.bfloat16), w2_ref[...],
                preferred_element_type=jnp.float32)                   # (TB, 128) f32
    a_out = out_ref.shape[1]                                          # narrow slab (8)
    out_ref[...] = y[:, :a_out] + b2_ref[...]                         # small f32 store


def prepare_params(w1, b1, w2, b2):
    """Pad hidden dim to 128 lanes, keep the output slab narrow, cast weights to bf16.

    w1: (S, H) f32, b1: (1, H) or (H,), w2: (H, A) f32, b2: (1, A) or (A,).
    Returns:
      w1p bf16 (S, 128), b1p f32 (1, 128), w2p bf16 (128, 128), b2p f32 (1, A_out)
    where A_out = round_up(A, 8).  Zero-padding preserves exact forward semantics.
    """
    S, H = w1.shape
    A = w2.shape[1]
    assert H <= LANE and A <= LANE
    a_out = min(LANE, _round_up(A, 8))
    w1p = jnp.zeros((S, LANE), jnp.float32).at[:, :H].set(w1).astype(jnp.bfloat16)
    b1p = jnp.zeros((1, LANE), jnp.float32).at[:, :H].set(b1.reshape(1, H))
    w2p = jnp.zeros((LANE, LANE), jnp.float32).at[:H, :A].set(w2).astype(jnp.bfloat16)
    b2p = jnp.zeros((1, a_out), jnp.float32).at[:, :A].set(b2.reshape(1, A))
    return w1p, b1p, w2p, b2p


def _cost(bp, S, a_out, sizes):
    w1n, b1n, w2n, b2n = sizes
    return pl.CostEstimate(
        flops=2 * bp * (S * LANE + LANE * LANE),
        transcendentals=0,
        bytes_accessed=(bp * S * 4            # x (f32 in HBM)
                        + w1n * 2 + w2n * 2   # bf16 weights
                        + (b1n + b2n) * 4     # f32 biases
                        + bp * a_out * 4),    # narrow f32 output
    )


def dqn_forward(x, params, action_size):
    """x: (B, state_size) f32.  params: output of prepare_params.
    Returns (B, action_size) f32."""
    w1p, b1p, w2p, b2p = params
    B, S = x.shape
    a_out = b2p.shape[1]
    sizes = (w1p.size, b1p.size, w2p.size, b2p.size)

    if B <= SMALL_BATCH_MAX:
        # Small batch: single VMEM-resident block, no grid -> no pipeline
        # prologue/epilogue, no padding, no wrapper-side passes over x.
        vmem = pl.BlockSpec(memory_space=pltpu.MemorySpace.VMEM)
        out = pl.pallas_call(
            dqn_kernel,
            out_shape=jax.ShapeDtypeStruct((B, a_out), jnp.float32),
            in_specs=[vmem, vmem, vmem, vmem, vmem],
            out_specs=vmem,
            cost_estimate=_cost(B, S, a_out, sizes),
        )(x, w1p, b1p, w2p, b2p)
        return out[:, :action_size]

    # Large batch: tile over the batch axis with an EVEN number of steps (>= 2)
    # so v7x's two TensorCores split the work evenly; tile up to 4096 rows to
    # amortize the ~0.35 us per-step pipeline overhead.  Weights/biases stay
    # resident (constant index maps).
    n_steps = max(2, _cdiv(B, BATCH_TILE_MAX))
    if n_steps % 2:
        n_steps += 1
    tb = _round_up(_cdiv(B, n_steps), ROW_TILE)
    bp = n_steps * tb
    xp = x if bp == B else jnp.pad(x, ((0, bp - B), (0, 0)))

    out = pl.pallas_call(
        dqn_kernel,
        out_shape=jax.ShapeDtypeStruct((bp, a_out), jnp.float32),
        grid=(n_steps,),
        in_specs=[
            pl.BlockSpec((tb, S), lambda i: (i, 0)),
            pl.BlockSpec(w1p.shape, lambda i: (0, 0)),
            pl.BlockSpec(b1p.shape, lambda i: (0, 0)),
            pl.BlockSpec(w2p.shape, lambda i: (0, 0)),
            pl.BlockSpec(b2p.shape, lambda i: (0, 0)),
        ],
        out_specs=pl.BlockSpec((tb, a_out), lambda i: (i, 0)),
        compiler_params=pltpu.CompilerParams(
            dimension_semantics=("parallel",)),
        cost_estimate=_cost(bp, S, a_out, sizes),
    )(xp, w1p, b1p, w2p, b2p)

    # Padded batch rows produce relu(b1)@W2 + b2 garbage: the batch slice must
    # stay.  The column slice is now over a tiny 8-wide array.
    return out[:B, :action_size]


def init_params(key, state_size, action_size, hidden=HIDDEN):
    # Mimics PyTorch Linear's U(-1/sqrt(fan_in), 1/sqrt(fan_in)) init;
    # weights stored transposed vs. PyTorch, i.e. (in_features, out_features).
    k1, k2, k3, k4 = jax.random.split(key, 4)
    lim1 = 1.0 / jnp.sqrt(state_size)
    lim2 = 1.0 / jnp.sqrt(hidden)
    w1 = jax.random.uniform(k1, (state_size, hidden), jnp.float32, -lim1, lim1)
    b1 = jax.random.uniform(k2, (1, hidden), jnp.float32, -lim1, lim1)
    w2 = jax.random.uniform(k3, (hidden, action_size), jnp.float32, -lim2, lim2)
    b2 = jax.random.uniform(k4, (1, action_size), jnp.float32, -lim2, lim2)
    return w1, b1, w2, b2


if __name__ == "__main__":
    key = jax.random.PRNGKey(0)
    kx, kp, kx2 = jax.random.split(key, 3)

    batch = 8
    state_size = 16
    action_size = 4

    x = jax.random.normal(kx, (batch, state_size), jnp.float32)
    w1, b1, w2, b2 = init_params(kp, state_size, action_size, HIDDEN)
    params = prepare_params(w1, b1, w2, b2)

    # Reference: same math with the same bf16-rounded operands the kernel feeds
    # to the MXU (f32 accumulation), so tolerances stay tight.
    # TODO(synk): if this path is reused for training, note that x and the
    # hidden activation are rounded to bf16 (double rounding) before the MXU.
    def ref_fwd(xf):
        xr = xf.astype(jnp.bfloat16).astype(jnp.float32)
        w1r = params[0].astype(jnp.float32)[:, :HIDDEN]
        w2r = params[2].astype(jnp.float32)[:HIDDEN, :action_size]
        h = jnp.maximum(xr @ w1r + b1, 0.0)
        return h.astype(jnp.bfloat16).astype(jnp.float32) @ w2r + b2

    # Small-batch path (grid-less, fully VMEM-resident).
    out = jax.block_until_ready(dqn_forward(x, params, action_size))
    assert out.shape == (batch, action_size)
    assert jnp.allclose(out, ref_fwd(x), atol=2e-2, rtol=2e-2)

    # Batch-tiled path (even parallel grid over batch, non-multiple batch to
    # exercise padding + batch-slice).
    big_batch = 2500
    x_big = jax.random.normal(kx2, (big_batch, state_size), jnp.float32)
    out_big = jax.block_until_ready(dqn_forward(x_big, params, action_size))
    assert out_big.shape == (big_batch, action_size)
    assert jnp.allclose(out_big, ref_fwd(x_big), atol=2e-2, rtol=2e-2)

    print("KERNEL_OK")
</pallas_src>

<mosaic_0001>
module attributes {stable_mosaic.version = 11 : i64} {
  func.func @dqn_kernel(%arg0: memref<8x16xf32, #tpu.memory_space<vmem>>, %arg1: memref<16x128xbf16, #tpu.memory_space<vmem>>, %arg2: memref<1x128xf32, #tpu.memory_space<vmem>>, %arg3: memref<128x128xbf16, #tpu.memory_space<vmem>>, %arg4: memref<1x8xf32, #tpu.memory_space<vmem>>, %arg5: memref<8x8xf32, #tpu.memory_space<vmem>>) attributes {dimension_semantics = [], scalar_prefetch = 0 : i64, scratch_operands = 0 : i64, tpu.core_type = #tpu.core_type<tc>} {
    %c0 = arith.constant 0 : index
    %c0_0 = arith.constant 0 : index
    %0 = vector.load %arg0[%c0, %c0_0] : memref<8x16xf32, #tpu.memory_space<vmem>>, vector<8x16xf32>
    %1 = arith.truncf %0 : vector<8x16xf32> to vector<8x16xbf16>
    %c0_1 = arith.constant 0 : index
    %c0_2 = arith.constant 0 : index
    %2 = vector.load %arg1[%c0_1, %c0_2] : memref<16x128xbf16, #tpu.memory_space<vmem>>, vector<16x128xbf16>
    %cst = arith.constant dense<0.000000e+00> : vector<8x128xf32>
    %3 = tpu.matmul %1, %2, %cst {dimension_numbers = #tpu.dot_dimension_numbers<[1], [0], [0], [1], [0, 0, 1, 1], [], []>} : vector<8x16xbf16>, vector<16x128xbf16>, vector<8x128xf32> -> vector<8x128xf32>
    %c0_3 = arith.constant 0 : index
    %c0_4 = arith.constant 0 : index
    %4 = vector.load %arg2[%c0_3, %c0_4] : memref<1x128xf32, #tpu.memory_space<vmem>>, vector<1x128xf32>
    %5 = vector.broadcast %4 : vector<1x128xf32> to vector<8x128xf32>
    %6 = arith.addf %3, %5 : vector<8x128xf32>
    %cst_5 = arith.constant 0.000000e+00 : f32
    %7 = vector.broadcast %cst_5 : f32 to vector<8x128xf32>
    %8 = arith.maximumf %6, %7 : vector<8x128xf32>
    %9 = arith.truncf %8 : vector<8x128xf32> to vector<8x128xbf16>
    %c0_6 = arith.constant 0 : index
    %c0_7 = arith.constant 0 : index
    %10 = vector.load %arg3[%c0_6, %c0_7] : memref<128x128xbf16, #tpu.memory_space<vmem>>, vector<128x128xbf16>
    %cst_8 = arith.constant dense<0.000000e+00> : vector<8x128xf32>
    %11 = tpu.matmul %9, %10, %cst_8 {dimension_numbers = #tpu.dot_dimension_numbers<[1], [0], [0], [1], [0, 0, 1, 1], [], []>} : vector<8x128xbf16>, vector<128x128xbf16>, vector<8x128xf32> -> vector<8x128xf32>
    %12 = vector.extract_strided_slice %11 {offsets = [0, 0], sizes = [8, 8], strides = [1, 1]} : vector<8x128xf32> to vector<8x8xf32>
    %c0_9 = arith.constant 0 : index
    %c0_10 = arith.constant 0 : index
    %13 = vector.load %arg4[%c0_9, %c0_10] : memref<1x8xf32, #tpu.memory_space<vmem>>, vector<1x8xf32>
    %14 = vector.broadcast %13 : vector<1x8xf32> to vector<8x8xf32>
    %15 = arith.addf %12, %14 : vector<8x8xf32>
    %c0_11 = arith.constant 0 : index
    %c0_12 = arith.constant 0 : index
    %16 = vector.load %arg5[%c0_11, %c0_12] : memref<8x8xf32, #tpu.memory_space<vmem>>, vector<8x8xf32>
    tpu.vector_store %arg5[%c0_11, %c0_12], %15 {strides = array<i32>} : memref<8x8xf32, #tpu.memory_space<vmem>>, vector<8x8xf32>,
    return
  }
}

</mosaic_0001>

<bundles_post_ra>
// kernel: tpu_custom_call.1
= control target key start
LH: loop header
LB: loop body
LE: loop exit
PB: predicated region body
PF: predicated region fallthrough
CT: control target
= control target key end

     0   :  { %10 = vsyncpa [#allocation3], 0  ;;  %s512_s0 = inlined_call_operand.hbm [shape: f32[8,16], index: 0, kind: input, shape index: {}]   ;;  %s513_s1 = inlined_call_operand.hbm [shape: bf16[16,128], index: 1, kind: input, shape index: {}]   ;;  %s514_s2 = inlined_call_operand.vmem [shape: f32[1,128], index: 2, kind: input, shape index: {}]   ;;  %s515_s3 = inlined_call_operand.hbm [shape: bf16[128,128], index: 3, kind: input, shape index: {}]   ;;  %s516_s4 = inlined_call_operand.vmem [shape: f32[1,8], index: 4, kind: input, shape index: {}]   ;;  %s517_s5 = inlined_call_operand.hbm [shape: f32[8,8], index: 5, kind: output, shape index: {}]  }
   0x1   :  { %11 = vsyncpa [#allocation6], 0 }
   0x2   :  { %12 = vsyncpa [#allocation4], 0  ;;  %s414_s18 = smov [#allocation5]   ;;  %s320_s22 = scalar_lea.hbm %s513_s1, 128 }
   0x3   :  { %s28_s19 = sshll.u32 %s414_s18, 4  ;;  %p321_p0 = scmp.ne.s32.totalorder %s513_s1, %s320_s22  ;;  %s29_s19 = int_to_ptr.vmem [resolvable:$true] %s28_s19 }
   0x4   :  { %p324_p1 = scmp.lt.u32.totalorder %s320_s22, %s513_s1 }
   0x6   :  { %p326_p2 = pnand %p324_p1, %p321_p0 }
   0x8   :  { %329 = shalt.err (!%p326_p2)
}
   0x9   :  { %s330_s27 = scalar_lea.vmem %s29_s19, 128  ;;  %p335_p4 = scmp.lt.s32.totalorder %s29_s19, %s29_s19 }
   0xa   :  { %p331_p3 = scmp.ne.s32.totalorder %s29_s19, %s330_s27  ;;  %p336_p5 = scmp.lt.s32.totalorder %s330_s27, %s330_s27 }
   0xc   :  { %p337_p6 = por %p336_p5, %p335_p4 }
   0xe   :  { %p338_p7 = pnand %p337_p6, %p331_p3 }
  0x10   :  { %341 = shalt.err (!%p338_p7)
}
  0x11   :  { %s415_s28 = smov 64   ;;  %s416_s29 = smov 4  }
  0x12   :  { %34 = dma.hbm_to_vmem [thread:$0]  %s513_s1, 128, %s29_s19, [#allocation6], %s415_s28, %s415_s28, %s416_s29  }
  0x13   :  { %s417_s7 = smov [#allocation2]   ;;  %s418_s9 = smov [#allocation7]  }
  0x14   :  { %s19_s8 = sshll.u32 %s417_s7, 4  ;;  %s42_s10 = sshll.u32 %s418_s9, 4  ;;  %s20_s8 = int_to_ptr.vmem [resolvable:$true] %s19_s8  ;;  %s43_s10 = int_to_ptr.vmem [resolvable:$true] %s42_s10 }
  0x15   :  { %s342_s13 = scalar_lea.hbm %s512_s0, 128 }
  0x16   :  { %p343_p8 = scmp.ne.s32.totalorder %s512_s0, %s342_s13  ;;  %p346_p9 = scmp.lt.u32.totalorder %s342_s13, %s512_s0 }
  0x18   :  { %p348_p10 = pnand %p346_p9, %p343_p8 }
  0x1a   :  { %351 = shalt.err (!%p348_p10)
}
  0x1b   :  { %s352_s1 = scalar_lea.vmem %s20_s8, 128  ;;  %p357_p12 = scmp.lt.s32.totalorder %s20_s8, %s20_s8 }
  0x1c   :  { %p353_p11 = scmp.ne.s32.totalorder %s20_s8, %s352_s1  ;;  %p358_p13 = scmp.lt.s32.totalorder %s352_s1, %s352_s1 }
  0x1e   :  { %p359_p0 = por %p358_p13, %p357_p12 }
  0x20   :  { %p360_p1 = pnand %p359_p0, %p353_p11 }
  0x22   :  { %363 = shalt.err (!%p360_p1)
}
  0x23   :  { %22 = dma.hbm_to_vmem [thread:$0]  %s512_s0, 128, %s20_s8, [#allocation3]  }
  0x24   :  { %s364_s22 = scalar_lea.hbm %s515_s3, 1024 }
  0x25   :  { %p365_p2 = scmp.ne.s32.totalorder %s515_s3, %s364_s22  ;;  %p368_p3 = scmp.lt.u32.totalorder %s364_s22, %s515_s3 }
  0x27   :  { %p370_p4 = pnand %p368_p3, %p365_p2 }
  0x29   :  { %373 = shalt.err (!%p370_p4)
}
  0x2a   :  { %s374_s27 = scalar_lea.vmem %s43_s10, 1024  ;;  %p379_p6 = scmp.lt.s32.totalorder %s43_s10, %s43_s10 }
  0x2b   :  { %p375_p5 = scmp.ne.s32.totalorder %s43_s10, %s374_s27  ;;  %p380_p7 = scmp.lt.s32.totalorder %s374_s27, %s374_s27 }
  0x2d   :  { %p381_p8 = por %p380_p7, %p379_p6 }
  0x2f   :  { %p382_p9 = pnand %p381_p8, %p375_p5 }
  0x31   :  { %385 = shalt.err (!%p382_p9)
}
  0x32   :  { %48 = dma.hbm_to_vmem [thread:$0]  %s515_s3, 1024, %s43_s10, [#allocation6], %s415_s28, %s415_s28, %s416_s29  }
  0x33   :  { %408 = dma.done.wait [#allocation3], 128  }
  0x34   :  { %409 = vsyncadd [#allocation3], 4294967168 }
  0x35   :  { %410 = dma.done.wait [#allocation6], 1152  }
  0x36   :  { %411 = vsyncadd [#allocation6], 4294966144  ;;  %v419_v0 = vmov 0.0   ;;  %vm420_vm0 = vmmov 0   ;;  %v311_v1 = vld [vmem:[#allocation5] sm:$0xff]   ;;  %v61_v2 = vld [vmem:[#allocation2] sm:$0xff] }
  0x37   :  { %277 = vmatprep.subr.bf16.mxu0 %v419_v0  ;;  %279 = vmatprep.mubr.msk.bf16.mxu0 %vm420_vm0, %v419_v0  ;;  %v62_v3 = vpack.c.bf16 %v61_v2, %v61_v2  ;;  %vm78_vm1 = vcmask 130048   ;;  %v312_v4 = vld [vmem:[#allocation7] sm:$0xff]   ;;  %v313_v5 = vld [vmem:[#allocation7 + $0x8] sm:$0xff]   ;;  %v314_v6 = vld [vmem:[#allocation7 + $0x10] sm:$0xff]   ;;  %s421_s7 = smov [#allocation8]   ;;  %vm236_vm2 = vcmask 64512  }
  0x38   :  { %283 = vmatprep.subr.bf16.mxu1 %v419_v0  ;;  %299 = vmatprep.mubr.msk.bf16.mxu1 %vm420_vm0, %v419_v0  ;;  %v315_v7 = vld [vmem:[#allocation7 + $0x18] sm:$0xff]   ;;  %v316_v8 = vld [vmem:[#allocation7 + $0x20] sm:$0xff]   ;;  %v317_v9 = vld [vmem:[#allocation7 + $0x28] sm:$0xff]   ;;  %s244_s8 = sshll.u32 %s421_s7, 4  ;;  %s245_s8 = int_to_ptr.vmem [resolvable:$true] %s244_s8 }
  0x39   :  { %278 = vmatpush3.bf16.msra.mxu0 %v311_v1  ;;  %284 = vmatpush3.bf16.msra.mxu1 %v312_v4  ;;  %v318_v10 = vld [vmem:[#allocation7 + $0x30] sm:$0xff]   ;;  %v319_v11 = vld [vmem:[#allocation7 + $0x38] sm:$0xff]   ;;  %p391_p11 = scmp.lt.s32.totalorder %s245_s8, %s245_s8 }
  0x3a   :  { %285 = vmatprep.subr.bf16.mxu1 %v419_v0  ;;  %v254_v12 = vld [vmem:[%s514_s2] ss:$0 sm:$0xff]  ;;  %s386_s2 = scalar_lea.vmem %s245_s8, 128 }
  0x3b   :  { %v265_v20 = vld [vmem:[%s516_s4] ss:$0 sm:$0xff]  ;;  %p387_p10 = scmp.ne.s32.totalorder %s245_s8, %s386_s2  ;;  %p392_p12 = scmp.lt.s32.totalorder %s386_s2, %s386_s2 }
  0x3c   :  { %280 = vmatmul.mubr.msk.bf16.vlgmr.msra.gmra.mrb[0].mxu0 %vm78_vm1, %v62_v3 }
  0x3d   :  { %286 = vmatpush3.bf16.msra.mxu1 %v313_v5  ;;  %p393_p13 = por %p392_p12, %p391_p11 }
  0x3e   :  { %287 = vmatprep.subr.bf16.mxu1 %v419_v0 }
  0x3f   :  { %p394_p0 = pnand %p393_p13, %p387_p10 }
  0x41   :  { %288 = vmatpush3.bf16.msra.mxu1 %v314_v6 }
  0x42   :  { %289 = vmatprep.subr.bf16.mxu1 %v419_v0 }
  0x45   :  { %290 = vmatpush3.bf16.msra.mxu1 %v315_v7 }
  0x46   :  { %291 = vmatprep.subr.bf16.mxu1 %v419_v0 }
  0x49   :  { %292 = vmatpush3.bf16.msra.mxu1 %v316_v8 }
  0x4a   :  { %293 = vmatprep.subr.bf16.mxu1 %v419_v0 }
  0x4d   :  { %294 = vmatpush3.bf16.msra.mxu1 %v317_v9 }
  0x4e   :  { %295 = vmatprep.subr.bf16.mxu1 %v419_v0 }
  0x51   :  { %296 = vmatpush3.bf16.msra.mxu1 %v318_v10 }
  0x52   :  { %297 = vmatprep.subr.bf16.mxu1 %v419_v0 }
  0x55   :  { %298 = vmatpush3.bf16.msra.mxu1 %v319_v11 }
 0x10f   :  { %v116_v13 = vpop.f32.mrb[0].mxu0 }
 0x110   :  { %v117_v14 = vadd.f32 %v254_v12, %v116_v13  ;;  %v281_v15 = vpop.f32.mrb[1].mxu0 }
 0x111   :  { %v119_v16 = vpop.f32.mrb[2].mxu0 }
 0x112   :  { %v122_v17 = vmax.f32 %v117_v14, 0.0  ;;  %v282_v18 = vpop.f32.mrb[3].mxu0 }
 0x114   :  { %v123_v19 = vpack.c.bf16 %v122_v17, %v122_v17 }
 0x116   :  { %300 = vmatmul.mubr.bf16.vlgmr.msra.gmra.mrb[0].mxu1 %v123_v19 }
 0x1e9   :  { %v222_v21 = vpop.f32.mrb[0].mxu1 }
 0x1ea   :  { %v235_v22 = vadd.f32 %v265_v20, %v222_v21  ;;  %v301_v23 = vpop.f32.mrb[1].mxu1 }
 0x1eb   :  { %v225_v24 = vpop.f32.mrb[2].mxu1 }
 0x1ec   :  { %v302_v25 = vpop.f32.mrb[3].mxu1  ;;  %237 = vst.msk [vmem:[#allocation8] sm:$0xff] %vm236_vm2, %v235_v22 }
 0x1ed   :  { %397 = shalt.err (!%p394_p0)
}
 0x1ee   :  { %s398_s4 = scalar_lea.hbm %s517_s5, 128 }
 0x1ef   :  { %p399_p1 = scmp.ne.s32.totalorder %s517_s5, %s398_s4  ;;  %p402_p2 = scmp.lt.u32.totalorder %s398_s4, %s517_s5 }
 0x1f1   :  { %p404_p3 = pnand %p402_p2, %p399_p1 }
 0x1f3   :  { %407 = shalt.err (!%p404_p3)
}
 0x1f4   :  { %247 = dma.vmem_to_hbm [thread:$0]  %s245_s8, 128, %s517_s5, [#allocation4]  }
 0x1f5   :  { %412 = dma.done.wait [#allocation4], 128  }
 0x1f6   :  { %413 = vsyncadd [#allocation4], 4294967168 }
 0x1f7   :  { %251 = vsyncpa [#allocation3], 1 }
 0x1f8   :  { %252 = vsyncpa [#allocation6], 1 }
 0x1f9   :  { %253 = vsyncpa [#allocation4], 1 }

</bundles_post_ra>
